<compile_context>
chip_gen: v7x
topology: tpu7x:2x2x1
jax: 0.10.0
libtpu: 0.0.40
codegen_flags: <defaults>
</compile_context>

<pallas_src>
import jax
import jax.numpy as jnp
from jax.experimental import pallas as pl
from jax.experimental.pallas import tpu as pltpu

K = 4           # Chebyshev filter order (GConvGRU(..., ..., 4))
HIDDEN = 128    # GConvGRU out_channels
TM_TARGET = 256 # row-tile target for large graphs


# ----------------------------- Pallas kernels --------------------------------

def cheb_step1_kernel(lhat_ref, x_ref, t1_ref):
    # T1[rows] = L_hat[rows, :] @ x        (bf16 MXU, f32 accumulation)
    t1_ref[...] = jnp.dot(lhat_ref[...], x_ref[...].astype(jnp.bfloat16),
                          preferred_element_type=jnp.float32)


def cheb_recur_kernel(lhat_ref, tprev_full_ref, tpp_tile_ref, tnext_ref):
    # T_k[rows] = 2 * L_hat[rows, :] @ T_{k-1} - T_{k-2}[rows]
    tnext_ref[...] = (2.0 * jnp.dot(lhat_ref[...],
                                    tprev_full_ref[...].astype(jnp.bfloat16),
                                    preferred_element_type=jnp.float32)
                      - tpp_tile_ref[...])


def gate_head_kernel(lhat_ref, x_ref, t1_ref, t2_tile_ref, t2_full_ref,
                     wg_ref, bg_ref, head_rhs_ref, blin_ref, out_ref):
    # Final Chebyshev step fused in:  T3[rows] = 2 * L_hat[rows,:] @ T2 - T1[rows]
    t1 = t1_ref[...]
    t2 = t2_tile_ref[...]
    t3 = (2.0 * jnp.dot(lhat_ref[...], t2_full_ref[...].astype(jnp.bfloat16),
                        preferred_element_type=jnp.float32) - t1)

    # Shared Chebyshev basis [tm, K*F]; one fused gate matmul -> [tm, 2*HIDDEN]
    basis = jnp.concatenate([x_ref[...], t1, t2, t3], axis=1)
    gates = (jnp.dot(basis, wg_ref[...], preferred_element_type=jnp.float32)
             + bg_ref[...])                         # bias hoisted, added once

    # GConvGRU with H0 == 0:
    #   z       = sigmoid(conv_xz(x) + conv_hz(0))      (h-side conv = bias, folded into bg)
    #   h_tilde = tanh(conv_xh(x) + conv_hh(0 * r))     (reset gate r cancels)
    #   h       = z * 0 + (1 - z) * h_tilde
    z = jax.nn.sigmoid(gates[:, :HIDDEN])
    h_tilde = jnp.tanh(gates[:, HIDDEN:])
    out_h = jnp.maximum((1.0 - z) * h_tilde, 0.0)    # relu(h)

    # Head: one MXU pass -> col 0 = Linear(128,1), col 1 = row-sum for logits.
    head = jnp.dot(out_h, head_rhs_ref[...], preferred_element_type=jnp.float32)
    col = jax.lax.broadcasted_iota(jnp.int32, head.shape, dimension=1)
    lin = head + blin_ref[...]
    logit = jnp.sqrt(jnp.maximum(head, 0.0))
    out_ref[...] = jnp.where(col == 0, lin, jnp.where(col == 1, logit, 0.0))


# ------------------------------- JAX glue -------------------------------------

def build_cheb_lhat(edge_index, edge_weight, num_nodes, lambda_max=2.0):
    """Dense L_hat = 2/lambda_max * (I - D^-1/2 A D^-1/2) - I  (sym norm)."""
    src = edge_index[0]
    dst = edge_index[1]
    w = edge_weight.astype(jnp.float32)
    deg = jnp.zeros((num_nodes,), jnp.float32).at[src].add(w)
    dinv = jnp.where(deg > 0.0, 1.0 / jnp.sqrt(jnp.maximum(deg, 1e-30)), 0.0)
    norm_w = dinv[src] * w * dinv[dst]
    # message passing aggregates into targets:  out[dst] += norm * x[src]
    a_norm = jnp.zeros((num_nodes, num_nodes), jnp.float32).at[dst, src].add(norm_w)
    l_sym = jnp.eye(num_nodes, dtype=jnp.float32) - a_norm
    return (2.0 / lambda_max) * l_sym - jnp.eye(num_nodes, dtype=jnp.float32)


def init_params(key, node_features, hidden=HIDDEN):
    def glorot(k, shape):
        fan_in, fan_out = shape[-2], shape[-1]
        lim = (6.0 / (fan_in + fan_out)) ** 0.5
        return jax.random.uniform(k, shape, jnp.float32, -lim, lim)

    keys = jax.random.split(key, 8)
    params = {}
    convs = [("xz", node_features), ("hz", hidden),
             ("xr", node_features), ("hr", hidden),
             ("xh", node_features), ("hh", hidden)]
    for i, (name, fin) in enumerate(convs):
        params["w_" + name] = glorot(keys[i], (K, fin, hidden))
        params["b_" + name] = jnp.zeros((1, hidden), jnp.float32)  # PyG ChebConv bias init
    params["w_lin"] = glorot(keys[6], (hidden, 1))
    lim = 1.0 / (hidden ** 0.5)
    params["b_lin"] = jax.random.uniform(keys[7], (1, 1), jnp.float32, -lim, lim)
    return params


def _round_up(v, m):
    return -(-v // m) * m


def ot_recurrent_gcn_forward(x, edge_index, edge_weight, params):
    n, f = x.shape
    lhat = build_cheb_lhat(edge_index, edge_weight, n)

    # Row tiling: pad N so the row tile tm divides it (tm multiple of 16 for bf16).
    tm = TM_TARGET if n >= TM_TARGET else _round_up(max(n, 16), 16)
    n_pad = _round_up(n, tm)
    n_tiles = n_pad // tm

    lhat_p = jnp.zeros((n_pad, n_pad), jnp.float32).at[:n, :n].set(lhat)
    lhat_p = lhat_p.astype(jnp.bfloat16)   # halves HBM traffic; f32 accumulation in-kernel
    x_p = jnp.zeros((n_pad, f), jnp.float32).at[:n, :].set(x)

    # H0 == 0 => only the xz / xh convs survive; fuse their weights into one
    # [K*F, 2*HIDDEN] matrix and fold the h-side ChebConv biases into the gate bias.
    # (w_xr / b_xr / w_hr / b_hr are provably dead for the first GRU step.)
    wg = jnp.concatenate([params["w_xz"].reshape(K * f, HIDDEN),
                          params["w_xh"].reshape(K * f, HIDDEN)], axis=1)
    bg = jnp.concatenate([params["b_xz"] + params["b_hz"],
                          params["b_xh"] + params["b_hh"]], axis=1)          # [1, 2*HIDDEN]

    # Head RHS: col 0 = Linear weight, col 1 = ones (logits row-sum), rest zero.
    head_rhs = jnp.concatenate(
        [params["w_lin"], jnp.ones((HIDDEN, 1), jnp.float32),
         jnp.zeros((HIDDEN, 126), jnp.float32)], axis=1)                     # [HIDDEN, 128]
    blin = params["b_lin"]                                                   # [1, 1]

    vmem_est = (2 * tm * n_pad * 2 + 4 * n_pad * f * 4 + 8 * tm * f * 4
                + 2 * tm * 128 * 4
                + (K * f * 2 * HIDDEN + 2 * HIDDEN + HIDDEN * 128) * 4
                + (2 << 20))
    cparams = pltpu.CompilerParams(
        dimension_semantics=("parallel",),
        vmem_limit_bytes=int(min(max(32 * 1024 * 1024, vmem_est),
                                 64 * 1024 * 1024)))

    lhat_spec = pl.BlockSpec((tm, n_pad), lambda i: (i, 0))
    tile_spec = pl.BlockSpec((tm, f), lambda i: (i, 0))
    full_spec = pl.BlockSpec((n_pad, f), lambda i: (0, 0))

    def param_spec(arr):
        nd = arr.ndim
        return pl.BlockSpec(arr.shape, lambda i, _nd=nd: (0,) * _nd)

    t_shape = jax.ShapeDtypeStruct((n_pad, f), jnp.float32)

    # T1 = L_hat @ x                       (row-tiled, pipelined, parallel rows)
    t1 = pl.pallas_call(
        cheb_step1_kernel, grid=(n_tiles,),
        in_specs=[lhat_spec, full_spec], out_specs=tile_spec,
        out_shape=t_shape, compiler_params=cparams,
    )(lhat_p, x_p)

    # T2 = 2 * L_hat @ T1 - x              (needs full T1 -> separate call)
    t2 = pl.pallas_call(
        cheb_recur_kernel, grid=(n_tiles,),
        in_specs=[lhat_spec, full_spec, tile_spec], out_specs=tile_spec,
        out_shape=t_shape, compiler_params=cparams,
    )(lhat_p, t1, x_p)

    # T3 + fused gates + fused head, lane-dense [n_pad, 128] output slab.
    slab = pl.pallas_call(
        gate_head_kernel, grid=(n_tiles,),
        in_specs=[lhat_spec, tile_spec, tile_spec, tile_spec, full_spec,
                  param_spec(wg), param_spec(bg), param_spec(head_rhs),
                  param_spec(blin)],
        out_specs=pl.BlockSpec((tm, 128), lambda i: (i, 0)),
        out_shape=jax.ShapeDtypeStruct((n_pad, 128), jnp.float32),
        compiler_params=cparams,
    )(lhat_p, x_p, t1, t2, t2, wg, bg, head_rhs, blin)

    out = slab[:n, 0:1]       # [N, 1]  Linear(relu(h))
    logits = slab[:n, 1]      # [N]     sqrt(sum(relu(h), axis=1))
    return out, logits


# --------------------------------- main ---------------------------------------

if __name__ == "__main__":
    key = jax.random.PRNGKey(0)
    k_x, k_p = jax.random.split(key)

    num_nodes = 16
    node_features = 8

    # small undirected ring graph (both edge directions present)
    src = jnp.arange(num_nodes, dtype=jnp.int32)
    dst = (src + 1) % num_nodes
    edge_index = jnp.stack([jnp.concatenate([src, dst]),
                            jnp.concatenate([dst, src])], axis=0)   # [2, 2N]
    edge_weight = jnp.ones((2 * num_nodes,), jnp.float32)

    x = jax.random.normal(k_x, (num_nodes, node_features), jnp.float32)
    params = init_params(k_p, node_features)

    out, logits = jax.jit(ot_recurrent_gcn_forward)(x, edge_index, edge_weight, params)
    jax.block_until_ready((out, logits))

    assert out.shape == (num_nodes, 1)
    assert logits.shape == (num_nodes,)
    assert bool(jnp.all(jnp.isfinite(out))) and bool(jnp.all(jnp.isfinite(logits)))
    print("KERNEL_OK")
</pallas_src>

<mosaic_0001>
module attributes {stable_mosaic.version = 11 : i64} {
  func.func private @main(%arg0: i32) attributes {dimension_semantics = [#tpu.dimension_semantics<core_parallel>], iteration_bounds = array<i64: 2>, tpu.core_type = #tpu.core_type<sc_scalar_subcore>, window_params = []} {
    return
  }
}

module attributes {stable_mosaic.version = 11 : i64} {
  func.func private @main(%arg0: i32) attributes {dimension_semantics = [#tpu.dimension_semantics<core_parallel>], iteration_bounds = array<i64: 2>, tpu.core_type = #tpu.core_type<sc_scalar_subcore>, window_params = []} {
    return
  }
}

module attributes {stable_mosaic.version = 11 : i64} {
  func.func @cheb_step1_kernel(%arg0: i32, %arg1: memref<16x16xbf16, #tpu.memory_space<vmem>>, %arg2: memref<16x8xf32, #tpu.memory_space<vmem>>, %arg3: memref<16x8xf32, #tpu.memory_space<vmem>>) attributes {dimension_semantics = [#tpu.dimension_semantics<parallel>], iteration_bounds = array<i64: 1>, scalar_prefetch = 0 : i64, scratch_operands = 0 : i64, tpu.core_type = #tpu.core_type<tc>, window_params = [{transform_indices = @transform_0, window_bounds = array<i64: 16, 16>}, {pipeline_mode = #tpu.pipeline_mode<synchronous>, transform_indices = @transform_1, window_bounds = array<i64: 16, 8>}, {transform_indices = @transform_2, window_bounds = array<i64: 16, 8>}]} {
    %c0 = arith.constant 0 : index
    %c0_0 = arith.constant 0 : index
    %0 = vector.load %arg1[%c0, %c0_0] : memref<16x16xbf16, #tpu.memory_space<vmem>>, vector<16x16xbf16>
    %c0_1 = arith.constant 0 : index
    %c0_2 = arith.constant 0 : index
    %1 = vector.load %arg2[%c0_1, %c0_2] : memref<16x8xf32, #tpu.memory_space<vmem>>, vector<16x8xf32>
    %2 = arith.truncf %1 : vector<16x8xf32> to vector<16x8xbf16>
    %cst = arith.constant dense<0.000000e+00> : vector<16x8xf32>
    %3 = tpu.matmul %0, %2, %cst {dimension_numbers = #tpu.dot_dimension_numbers<[1], [0], [0], [1], [0, 0, 1, 1], [], []>} : vector<16x16xbf16>, vector<16x8xbf16>, vector<16x8xf32> -> vector<16x8xf32>
    %c0_3 = arith.constant 0 : index
    %c0_4 = arith.constant 0 : index
    %4 = vector.load %arg3[%c0_3, %c0_4] : memref<16x8xf32, #tpu.memory_space<vmem>>, vector<16x8xf32>
    tpu.vector_store %arg3[%c0_3, %c0_4], %3 {strides = array<i32>} : memref<16x8xf32, #tpu.memory_space<vmem>>, vector<16x8xf32>,
    return
  }
  func.func @transform_0(%arg0: i32) -> (i32, i32) {
    %c0_i32 = arith.constant 0 : i32
    %c0_i32_0 = arith.constant 0 : i32
    return %arg0, %c0_i32 : i32, i32
  }
  func.func @transform_1(%arg0: i32) -> (i32, i32) {
    %c0_i32 = arith.constant 0 : i32
    %c0_i32_0 = arith.constant 0 : i32
    %c0_i32_1 = arith.constant 0 : i32
    return %c0_i32, %c0_i32_0 : i32, i32
  }
  func.func @transform_2(%arg0: i32) -> (i32, i32) {
    %c0_i32 = arith.constant 0 : i32
    %c0_i32_0 = arith.constant 0 : i32
    return %arg0, %c0_i32 : i32, i32
  }
}

module attributes {stable_mosaic.version = 11 : i64} {
  func.func @cheb_recur_kernel(%arg0: i32, %arg1: memref<16x16xbf16, #tpu.memory_space<vmem>>, %arg2: memref<16x8xf32, #tpu.memory_space<vmem>>, %arg3: memref<16x8xf32, #tpu.memory_space<vmem>>, %arg4: memref<16x8xf32, #tpu.memory_space<vmem>>) attributes {dimension_semantics = [#tpu.dimension_semantics<parallel>], iteration_bounds = array<i64: 1>, scalar_prefetch = 0 : i64, scratch_operands = 0 : i64, tpu.core_type = #tpu.core_type<tc>, window_params = [{transform_indices = @transform_0, window_bounds = array<i64: 16, 16>}, {pipeline_mode = #tpu.pipeline_mode<synchronous>, transform_indices = @transform_1, window_bounds = array<i64: 16, 8>}, {transform_indices = @transform_2, window_bounds = array<i64: 16, 8>}, {transform_indices = @transform_3, window_bounds = array<i64: 16, 8>}]} {
    %c0 = arith.constant 0 : index
    %c0_0 = arith.constant 0 : index
    %0 = vector.load %arg1[%c0, %c0_0] : memref<16x16xbf16, #tpu.memory_space<vmem>>, vector<16x16xbf16>
    %c0_1 = arith.constant 0 : index
    %c0_2 = arith.constant 0 : index
    %1 = vector.load %arg2[%c0_1, %c0_2] : memref<16x8xf32, #tpu.memory_space<vmem>>, vector<16x8xf32>
    %2 = arith.truncf %1 : vector<16x8xf32> to vector<16x8xbf16>
    %cst = arith.constant dense<0.000000e+00> : vector<16x8xf32>
    %3 = tpu.matmul %0, %2, %cst {dimension_numbers = #tpu.dot_dimension_numbers<[1], [0], [0], [1], [0, 0, 1, 1], [], []>} : vector<16x16xbf16>, vector<16x8xbf16>, vector<16x8xf32> -> vector<16x8xf32>
    %cst_3 = arith.constant 2.000000e+00 : f32
    %4 = vector.broadcast %cst_3 : f32 to vector<16x8xf32>
    %5 = arith.mulf %4, %3 : vector<16x8xf32>
    %c0_4 = arith.constant 0 : index
    %c0_5 = arith.constant 0 : index
    %6 = vector.load %arg3[%c0_4, %c0_5] : memref<16x8xf32, #tpu.memory_space<vmem>>, vector<16x8xf32>
    %7 = arith.subf %5, %6 : vector<16x8xf32>
    %c0_6 = arith.constant 0 : index
    %c0_7 = arith.constant 0 : index
    %8 = vector.load %arg4[%c0_6, %c0_7] : memref<16x8xf32, #tpu.memory_space<vmem>>, vector<16x8xf32>
    tpu.vector_store %arg4[%c0_6, %c0_7], %7 {strides = array<i32>} : memref<16x8xf32, #tpu.memory_space<vmem>>, vector<16x8xf32>,
    return
  }
  func.func @transform_0(%arg0: i32) -> (i32, i32) {
    %c0_i32 = arith.constant 0 : i32
    %c0_i32_0 = arith.constant 0 : i32
    return %arg0, %c0_i32 : i32, i32
  }
  func.func @transform_1(%arg0: i32) -> (i32, i32) {
    %c0_i32 = arith.constant 0 : i32
    %c0_i32_0 = arith.constant 0 : i32
    %c0_i32_1 = arith.constant 0 : i32
    return %c0_i32, %c0_i32_0 : i32, i32
  }
  func.func @transform_2(%arg0: i32) -> (i32, i32) {
    %c0_i32 = arith.constant 0 : i32
    %c0_i32_0 = arith.constant 0 : i32
    return %arg0, %c0_i32 : i32, i32
  }
  func.func @transform_3(%arg0: i32) -> (i32, i32) {
    %c0_i32 = arith.constant 0 : i32
    %c0_i32_0 = arith.constant 0 : i32
    return %arg0, %c0_i32 : i32, i32
  }
}

module attributes {stable_mosaic.version = 11 : i64} {
  func.func @gate_head_kernel(%arg0: i32, %arg1: memref<16x16xbf16, #tpu.memory_space<vmem>>, %arg2: memref<16x8xf32, #tpu.memory_space<vmem>>, %arg3: memref<16x8xf32, #tpu.memory_space<vmem>>, %arg4: memref<16x8xf32, #tpu.memory_space<vmem>>, %arg5: memref<16x8xf32, #tpu.memory_space<vmem>>, %arg6: memref<32x256xf32, #tpu.memory_space<vmem>>, %arg7: memref<1x256xf32, #tpu.memory_space<vmem>>, %arg8: memref<128x128xf32, #tpu.memory_space<vmem>>, %arg9: memref<1x1xf32, #tpu.memory_space<vmem>>, %arg10: memref<16x128xf32, #tpu.memory_space<vmem>>) attributes {dimension_semantics = [#tpu.dimension_semantics<parallel>], iteration_bounds = array<i64: 1>, scalar_prefetch = 0 : i64, scratch_operands = 0 : i64, tpu.core_type = #tpu.core_type<tc>, window_params = [{transform_indices = @transform_0, window_bounds = array<i64: 16, 16>}, {transform_indices = @transform_1, window_bounds = array<i64: 16, 8>}, {transform_indices = @transform_2, window_bounds = array<i64: 16, 8>}, {transform_indices = @transform_3, window_bounds = array<i64: 16, 8>}, {pipeline_mode = #tpu.pipeline_mode<synchronous>, transform_indices = @transform_4, window_bounds = array<i64: 16, 8>}, {pipeline_mode = #tpu.pipeline_mode<synchronous>, transform_indices = @transform_5, window_bounds = array<i64: 32, 256>}, {pipeline_mode = #tpu.pipeline_mode<synchronous>, transform_indices = @transform_6, window_bounds = array<i64: 1, 256>}, {pipeline_mode = #tpu.pipeline_mode<synchronous>, transform_indices = @transform_7, window_bounds = array<i64: 128, 128>}, {pipeline_mode = #tpu.pipeline_mode<synchronous>, transform_indices = @transform_8, window_bounds = array<i64: 1, 1>}, {transform_indices = @transform_9, window_bounds = array<i64: 16, 128>}]} {
    %c0 = arith.constant 0 : index
    %c0_0 = arith.constant 0 : index
    %0 = vector.load %arg3[%c0, %c0_0] : memref<16x8xf32, #tpu.memory_space<vmem>>, vector<16x8xf32>
    %c0_1 = arith.constant 0 : index
    %c0_2 = arith.constant 0 : index
    %1 = vector.load %arg4[%c0_1, %c0_2] : memref<16x8xf32, #tpu.memory_space<vmem>>, vector<16x8xf32>
    %c0_3 = arith.constant 0 : index
    %c0_4 = arith.constant 0 : index
    %2 = vector.load %arg1[%c0_3, %c0_4] : memref<16x16xbf16, #tpu.memory_space<vmem>>, vector<16x16xbf16>
    %c0_5 = arith.constant 0 : index
    %c0_6 = arith.constant 0 : index
    %3 = vector.load %arg5[%c0_5, %c0_6] : memref<16x8xf32, #tpu.memory_space<vmem>>, vector<16x8xf32>
    %4 = arith.truncf %3 : vector<16x8xf32> to vector<16x8xbf16>
    %cst = arith.constant dense<0.000000e+00> : vector<16x8xf32>
    %5 = tpu.matmul %2, %4, %cst {dimension_numbers = #tpu.dot_dimension_numbers<[1], [0], [0], [1], [0, 0, 1, 1], [], []>} : vector<16x16xbf16>, vector<16x8xbf16>, vector<16x8xf32> -> vector<16x8xf32>
    %cst_7 = arith.constant 2.000000e+00 : f32
    %6 = vector.broadcast %cst_7 : f32 to vector<16x8xf32>
    %7 = arith.mulf %6, %5 : vector<16x8xf32>
    %8 = arith.subf %7, %0 : vector<16x8xf32>
    %c0_8 = arith.constant 0 : index
    %c0_9 = arith.constant 0 : index
    %9 = vector.load %arg2[%c0_8, %c0_9] : memref<16x8xf32, #tpu.memory_space<vmem>>, vector<16x8xf32>
    %10 = tpu.concatenate %9, %0, %1, %8 in 1 : vector<16x8xf32>, vector<16x8xf32>, vector<16x8xf32>, vector<16x8xf32> -> vector<16x32xf32>
    %c0_10 = arith.constant 0 : index
    %c0_11 = arith.constant 0 : index
    %11 = vector.load %arg6[%c0_10, %c0_11] : memref<32x256xf32, #tpu.memory_space<vmem>>, vector<32x256xf32>
    %cst_12 = arith.constant dense<0.000000e+00> : vector<16x256xf32>
    %12 = tpu.matmul %10, %11, %cst_12 {dimension_numbers = #tpu.dot_dimension_numbers<[1], [0], [0], [1], [0, 0, 1, 1], [], []>} : vector<16x32xf32>, vector<32x256xf32>, vector<16x256xf32> -> vector<16x256xf32>
    %c0_13 = arith.constant 0 : index
    %c0_14 = arith.constant 0 : index
    %13 = vector.load %arg7[%c0_13, %c0_14] : memref<1x256xf32, #tpu.memory_space<vmem>>, vector<1x256xf32>
    %14 = vector.broadcast %13 : vector<1x256xf32> to vector<16x256xf32>
    %15 = arith.addf %12, %14 : vector<16x256xf32>
    %16 = vector.extract_strided_slice %15 {offsets = [0, 0], sizes = [16, 128], strides = [1, 1]} : vector<16x256xf32> to vector<16x128xf32>
    %17 = arith.negf %16 : vector<16x128xf32>
    %18 = math.exp %17 : vector<16x128xf32>
    %cst_15 = arith.constant 1.000000e+00 : f32
    %19 = vector.broadcast %cst_15 : f32 to vector<16x128xf32>
    %20 = arith.addf %19, %18 : vector<16x128xf32>
    %21 = arith.divf %19, %20 : vector<16x128xf32>
    %22 = vector.extract_strided_slice %15 {offsets = [0, 128], sizes = [16, 128], strides = [1, 1]} : vector<16x256xf32> to vector<16x128xf32>
    %23 = math.tanh %22 : vector<16x128xf32>
    %cst_16 = arith.constant 1.000000e+00 : f32
    %24 = vector.broadcast %cst_16 : f32 to vector<16x128xf32>
    %25 = arith.subf %24, %21 : vector<16x128xf32>
    %26 = arith.mulf %25, %23 : vector<16x128xf32>
    %cst_17 = arith.constant 0.000000e+00 : f32
    %27 = vector.broadcast %cst_17 : f32 to vector<16x128xf32>
    %28 = arith.maximumf %26, %27 : vector<16x128xf32>
    %c0_18 = arith.constant 0 : index
    %c0_19 = arith.constant 0 : index
    %29 = vector.load %arg8[%c0_18, %c0_19] : memref<128x128xf32, #tpu.memory_space<vmem>>, vector<128x128xf32>
    %cst_20 = arith.constant dense<0.000000e+00> : vector<16x128xf32>
    %30 = tpu.matmul %28, %29, %cst_20 {dimension_numbers = #tpu.dot_dimension_numbers<[1], [0], [0], [1], [0, 0, 1, 1], [], []>} : vector<16x128xf32>, vector<128x128xf32>, vector<16x128xf32> -> vector<16x128xf32>
    %31 = tpu.iota {dimensions = array<i32: 1>} : vector<16x128xi32>
    %c0_21 = arith.constant 0 : index
    %c0_22 = arith.constant 0 : index
    %32 = vector.load %arg9[%c0_21, %c0_22] : memref<1x1xf32, #tpu.memory_space<vmem>>, vector<1x1xf32>
    %33 = vector.broadcast %32 : vector<1x1xf32> to vector<16x128xf32>
    %34 = arith.addf %30, %33 : vector<16x128xf32>
    %cst_23 = arith.constant 0.000000e+00 : f32
    %35 = vector.broadcast %cst_23 : f32 to vector<16x128xf32>
    %36 = arith.maximumf %30, %35 : vector<16x128xf32>
    %37 = math.sqrt %36 : vector<16x128xf32>
    %c0_i32 = arith.constant 0 : i32
    %38 = vector.broadcast %c0_i32 : i32 to vector<16x128xi32>
    %39 = arith.cmpi eq, %31, %38 : vector<16x128xi32>
    %c1_i32 = arith.constant 1 : i32
    %40 = vector.broadcast %c1_i32 : i32 to vector<16x128xi32>
    %41 = arith.cmpi eq, %31, %40 : vector<16x128xi32>
    %cst_24 = arith.constant 0.000000e+00 : f32
    %42 = vector.broadcast %cst_24 : f32 to vector<16x128xf32>
    %43 = arith.select %41, %37, %42 : vector<16x128xi1>, vector<16x128xf32>
    %44 = arith.select %39, %34, %43 : vector<16x128xi1>, vector<16x128xf32>
    %c0_25 = arith.constant 0 : index
    %c0_26 = arith.constant 0 : index
    %45 = vector.load %arg10[%c0_25, %c0_26] : memref<16x128xf32, #tpu.memory_space<vmem>>, vector<16x128xf32>
    tpu.vector_store %arg10[%c0_25, %c0_26], %44 {strides = array<i32>} : memref<16x128xf32, #tpu.memory_space<vmem>>, vector<16x128xf32>,
    return
  }
  func.func @transform_0(%arg0: i32) -> (i32, i32) {
    %c0_i32 = arith.constant 0 : i32
    %c0_i32_0 = arith.constant 0 : i32
    return %arg0, %c0_i32 : i32, i32
  }
  func.func @transform_1(%arg0: i32) -> (i32, i32) {
    %c0_i32 = arith.constant 0 : i32
    %c0_i32_0 = arith.constant 0 : i32
    return %arg0, %c0_i32 : i32, i32
  }
  func.func @transform_2(%arg0: i32) -> (i32, i32) {
    %c0_i32 = arith.constant 0 : i32
    %c0_i32_0 = arith.constant 0 : i32
    return %arg0, %c0_i32 : i32, i32
  }
  func.func @transform_3(%arg0: i32) -> (i32, i32) {
    %c0_i32 = arith.constant 0 : i32
    %c0_i32_0 = arith.constant 0 : i32
    return %arg0, %c0_i32 : i32, i32
  }
  func.func @transform_4(%arg0: i32) -> (i32, i32) {
    %c0_i32 = arith.constant 0 : i32
    %c0_i32_0 = arith.constant 0 : i32
    %c0_i32_1 = arith.constant 0 : i32
    return %c0_i32, %c0_i32_0 : i32, i32
  }
  func.func @transform_5(%arg0: i32) -> (i32, i32) {
    %c0_i32 = arith.constant 0 : i32
    %c0_i32_0 = arith.constant 0 : i32
    %c0_i32_1 = arith.constant 0 : i32
    return %c0_i32, %c0_i32_0 : i32, i32
  }
  func.func @transform_6(%arg0: i32) -> (i32, i32) {
    %c0_i32 = arith.constant 0 : i32
    %c0_i32_0 = arith.constant 0 : i32
    %c0_i32_1 = arith.constant 0 : i32
    return %c0_i32, %c0_i32_0 : i32, i32
  }
  func.func @transform_7(%arg0: i32) -> (i32, i32) {
    %c0_i32 = arith.constant 0 : i32
    %c0_i32_0 = arith.constant 0 : i32
    %c0_i32_1 = arith.constant 0 : i32
    return %c0_i32, %c0_i32_0 : i32, i32
  }
  func.func @transform_8(%arg0: i32) -> (i32, i32) {
    %c0_i32 = arith.constant 0 : i32
    %c0_i32_0 = arith.constant 0 : i32
    %c0_i32_1 = arith.constant 0 : i32
    return %c0_i32, %c0_i32_0 : i32, i32
  }
  func.func @transform_9(%arg0: i32) -> (i32, i32) {
    %c0_i32 = arith.constant 0 : i32
    %c0_i32_0 = arith.constant 0 : i32
    return %arg0, %c0_i32 : i32, i32
  }
}

</mosaic_0001>

<bundles_post_ra>
// kernel: ot_recurrent_gcn_forward.4
= control target key start
LH: loop header
LB: loop body
LE: loop exit
PB: predicated region body
PF: predicated region fallthrough
CT: control target
= control target key end

     0   :  { %v96_v0 = vmov 0.0   ;;  %vm97_vm0 = vmmov 0   ;;  %vm25_vm1 = vcmask 130048   ;;  %vm76_vm2 = vcmask 64512   ;;  %s139_s1 = inlined_call_operand.vmem [shape: f32[16,8], index: 1, kind: input, shape index: {}]   ;;  %s140_s0 = inlined_call_operand.vmem [shape: bf16[16,16], index: 0, kind: input, shape index: {}]   ;;  %s141_s2 = inlined_call_operand.vmem [shape: f32[16,8], index: 2, kind: input, shape index: {}]   ;;  %s142_s3 = inlined_call_operand.vmem [shape: f32[16,8], index: 3, kind: output, shape index: {}]  }
   0x1   :  { %87 = vmatprep.subr.bf16.mxu0 %v96_v0  ;;  %v17_v1 = vld [vmem:[%s139_s1] sm:$0xff]  ;;  %v18_v2 = vld [vmem:[%s139_s1 + $0x8] sm:$0xff]  ;;  %89 = vmatprep.mubr.msk.bf16.mxu0 %vm97_vm0, %v96_v0 }
   0x2   :  { %v19_v3 = vpack.c.bf16 %v18_v2, %v17_v1  ;;  %v95_v4 = vld [vmem:[%s140_s0] sm:$0xff]   ;;  %v73_v10 = vld [vmem:[%s141_s2 + $0x8] sm:$0xff] }
   0x3   :  { %v72_v6 = vld [vmem:[%s141_s2] sm:$0xff] }
   0x4   :  { %88 = vmatpush3.bf16.msra.mxu0 %v19_v3 }
   0x7   :  { %90 = vmatmul.mubr.msk.bf16.vlgmr.msra.gmra.mrb[0].mxu0 %vm25_vm1, %v95_v4 }
  0xda   :  { %v63_v5 = vpop.f32.mrb[0].mxu0 }
  0xdb   :  { %v70_v7 = vmul.f32 2.0, %v63_v5  ;;  %v91_v8 = vpop.f32.mrb[1].mxu0 }
  0xdc   :  { %v66_v9 = vpop.f32.mrb[2].mxu0 }
  0xdd   :  { %v74_v11 = vsub.f32 %v70_v7, %v72_v6  ;;  %v71_v12 = vmul.f32 2.0, %v66_v9  ;;  %v92_v13 = vpop.f32.mrb[3].mxu0 }
  0xdf   :  { %77 = vst.msk [vmem:[%s142_s3] sm:$0xff] %vm76_vm2, %v74_v11  ;;  %v75_v14 = vsub.f32 %v71_v12, %v73_v10 }
  0xe1   :  { %78 = vst.msk [vmem:[%s142_s3 + $0x8] sm:$0xff] %vm76_vm2, %v75_v14 }

// kernel: ot_recurrent_gcn_forward.3
= control target key start
LH: loop header
LB: loop body
LE: loop exit
PB: predicated region body
PF: predicated region fallthrough
CT: control target
= control target key end

     0   :  { %v87_v0 = vmov 0.0   ;;  %vm88_vm0 = vmmov 0   ;;  %vm22_vm1 = vcmask 130048   ;;  %vm67_vm2 = vcmask 64512   ;;  %s119_s1 = inlined_call_operand.vmem [shape: f32[16,8], index: 1, kind: input, shape index: {}]   ;;  %s120_s0 = inlined_call_operand.vmem [shape: bf16[16,16], index: 0, kind: input, shape index: {}]   ;;  %s121_s2 = inlined_call_operand.vmem [shape: f32[16,8], index: 2, kind: output, shape index: {}]  }
   0x1   :  { %78 = vmatprep.subr.bf16.mxu0 %v87_v0  ;;  %v14_v1 = vld [vmem:[%s119_s1] sm:$0xff]  ;;  %v15_v2 = vld [vmem:[%s119_s1 + $0x8] sm:$0xff]  ;;  %80 = vmatprep.mubr.msk.bf16.mxu0 %vm88_vm0, %v87_v0 }
   0x2   :  { %v16_v3 = vpack.c.bf16 %v15_v2, %v14_v1  ;;  %v86_v4 = vld [vmem:[%s120_s0] sm:$0xff]  }
   0x4   :  { %79 = vmatpush3.bf16.msra.mxu0 %v16_v3 }
   0x7   :  { %81 = vmatmul.mubr.msk.bf16.vlgmr.msra.gmra.mrb[0].mxu0 %vm22_vm1, %v86_v4 }
  0xda   :  { %v60_v5 = vpop.f32.mrb[0].mxu0 }
  0xdb   :  { %68 = vst.msk [vmem:[%s121_s2] sm:$0xff] %vm67_vm2, %v60_v5  ;;  %v82_v6 = vpop.f32.mrb[1].mxu0 }
  0xdc   :  { %v63_v7 = vpop.f32.mrb[2].mxu0 }
  0xdd   :  { %69 = vst.msk [vmem:[%s121_s2 + $0x8] sm:$0xff] %vm67_vm2, %v63_v7  ;;  %v83_v8 = vpop.f32.mrb[3].mxu0 }

// kernel: ot_recurrent_gcn_forward.5
= control target key start
LH: loop header
LB: loop body
LE: loop exit
PB: predicated region body
PF: predicated region fallthrough
CT: control target
= control target key end

     0   :  { %v521_v0 = vmov 0.0   ;;  %vm522_vm0 = vmmov 0   ;;  %s523_s17 = smov 8   ;;  %vm49_vm1 = vcmask 130048   ;;  %s525_s16 = smov 24   ;;  %vm124_vm2 = vcmask 64512   ;;  %s697_s4 = inlined_call_operand.vmem [shape: f32[16,8], index: 4, kind: input, shape index: {}, may-alias: {3,4}]   ;;  %s698_s0 = inlined_call_operand.vmem [shape: bf16[16,16], index: 0, kind: input, shape index: {}]   ;;  %s699_s2 = inlined_call_operand.vmem [shape: f32[16,8], index: 2, kind: input, shape index: {}]   ;;  %s700_s3 = inlined_call_operand.vmem [shape: f32[16,8], index: 3, kind: input, shape index: {}, may-alias: {3,4}]   ;;  %s701_s5 = inlined_call_operand.vmem [shape: f32[32,256], index: 5, kind: input, shape index: {}]   ;;  %s702_s1 = inlined_call_operand.vmem [shape: f32[16,8], index: 1, kind: input, shape index: {}]   ;;  %s703_s7 = inlined_call_operand.vmem [shape: f32[128,128], index: 7, kind: input, shape index: {}]   ;;  %s704_s8 = inlined_call_operand.<no memory space> [shape: f32[1,1], index: 8, kind: input, shape index: {}]   ;;  %s705_s6 = inlined_call_operand.vmem [shape: f32[1,256], index: 6, kind: input, shape index: {}]   ;;  %s706_s9 = inlined_call_operand.vmem [shape: f32[16,128], index: 9, kind: output, shape index: {}]  }
   0x1   :  { %416 = vmatprep.subr.bf16.mxu1 %v521_v0  ;;  %v41_v1 = vld [vmem:[%s697_s4] sm:$0xff]  ;;  %v42_v2 = vld [vmem:[%s697_s4 + $0x8] sm:$0xff]  ;;  %418 = vmatprep.mubr.msk.bf16.mxu1 %vm522_vm0, %v521_v0  ;;  %s524_s4 = smov 16   ;;  %v135_v10 = vld [vmem:[%s701_s5 + $0x18] sm:$0xff]  ;;  %vm129_vm3 = vcmask 195584   ;;  %vm152_vm4 = vcmask 261120  }
   0x2   :  { %v43_v3 = vpack.c.bf16 %v42_v2, %v41_v1  ;;  %v35_v4 = vld [vmem:[%s699_s2] sm:$0xff]  ;;  %v36_v7 = vld [vmem:[%s699_s2 + $0x8] sm:$0xff]  ;;  %v134_v13 = vld [vmem:[%s701_s5 + $0x10] sm:$0xff] }
   0x3   :  { %v504_v5 = vld [vmem:[%s698_s0] sm:$0xff]   ;;  %102 = vrot.lane.b32.xlu0 %v35_v4, %s523_s17  ;;  %104 = vrot.lane.b32.xlu1 %v36_v7, %s523_s17  ;;  %v38_v8 = vld [vmem:[%s700_s3 + $0x8] sm:$0xff] }
   0x4   :  { %417 = vmatpush3.bf16.msra.mxu1 %v43_v3  ;;  %v37_v6 = vld [vmem:[%s700_s3] sm:$0xff]  ;;  %v133_v9 = vld [vmem:[%s701_s5 + $0x8] sm:$0xff]  ;;  %v139_v16 = vld [vmem:[%s701_s5 + $0x38] sm:$0xff]  ;;  %v526_v3 = vmov 0  }
   0x5   :  { %v457_v11 = vpack.c.bf16 %v135_v10, %v133_v9  ;;  %v132_v12 = vld [vmem:[%s701_s5] sm:$0xff]  ;;  %v137_v15 = vld [vmem:[%s701_s5 + $0x28] sm:$0xff]  ;;  %v138_v19 = vld [vmem:[%s701_s5 + $0x30] sm:$0xff]  ;;  %503 = vset.pattern.permute.xlu0 %v526_v3 }
   0x6   :  { %v459_v14 = vpack.c.bf16 %v134_v13, %v132_v12  ;;  %v136_v17 = vld [vmem:[%s701_s5 + $0x20] sm:$0xff]  ;;  %v461_v18 = vpack.c.bf16 %v139_v16, %v137_v15  ;;  %v99_v34 = vld [vmem:[%s702_s1 + $0x8] sm:$0xff]  ;;  %v258_v46 = vld [vmem:[%s703_s7 + $0x10] sm:$0xff] }
   0x7   :  { %419 = vmatmul.mubr.msk.bf16.vlgmr.msra.gmra.mrb[0].mxu1 %vm49_vm1, %v504_v5  ;;  %110 = vrot.lane.b32.xlu0 %v37_v6, %s524_s4  ;;  %v463_v20 = vpack.c.bf16 %v138_v19, %v136_v17  ;;  %v98_v30 = vld [vmem:[%s702_s1] sm:$0xff]  ;;  %v257_v44 = vld [vmem:[%s703_s7 + $0x8] sm:$0xff]  ;;  %v259_v47 = vld [vmem:[%s703_s7 + $0x18] sm:$0xff]  ;;  %v142_v6 = vlaneseq }
   0x8   :  { %223 = vmatprep.mubr.f32.mxu1 %v521_v0  ;;  %458 = vmatprep.subr.bf16.mxu1 %v457_v11  ;;  %v256_v43 = vld [vmem:[%s703_s7] sm:$0xff]  ;;  %v469_v48 = vpack.c.bf16 %v259_v47, %v258_v46  ;;  %v261_v50 = vld [vmem:[%s703_s7 + $0x28] sm:$0xff]  ;;  %v262_v52 = vld [vmem:[%s703_s7 + $0x30] sm:$0xff] }
   0x9   :  { %460 = vmatpush1.bf16.msra.mxu1 %v459_v14  ;;  %v465_v45 = vpack.c.bf16 %v257_v44, %v256_v43  ;;  %v260_v49 = vld [vmem:[%s703_s7 + $0x20] sm:$0xff]  ;;  %v263_v53 = vld [vmem:[%s703_s7 + $0x38] sm:$0xff]  ;;  %v265_v56 = vld [vmem:[%s703_s7 + $0x48] sm:$0xff] }
   0xa   :  { %462 = vmatprep.subr.bf16.mxu1 %v461_v18  ;;  %v473_v51 = vpack.c.bf16 %v261_v50, %v260_v49  ;;  %v477_v54 = vpack.c.bf16 %v263_v53, %v262_v52  ;;  %v264_v55 = vld [vmem:[%s703_s7 + $0x40] sm:$0xff]  ;;  %v266_v58 = vld [vmem:[%s703_s7 + $0x50] sm:$0xff]  ;;  %v267_v59 = vld [vmem:[%s703_s7 + $0x58] sm:$0xff] }
   0xb   :  { %112 = vrot.lane.b32.xlu0 %v38_v8, %s524_s4  ;;  %466 = vmatprep.subr.bf16.mxu0 %v465_v45  ;;  %v481_v57 = vpack.c.bf16 %v265_v56, %v264_v55  ;;  %v268_v60 = vld [vmem:[%s703_s7 + $0x60] sm:$0xff]  ;;  %v485_v61 = vpack.c.bf16 %v267_v59, %v266_v58  ;;  %v269_v62 = vld [vmem:[%s703_s7 + $0x68] sm:$0xff]  ;;  %v271_v1 = vld [vmem:[%s703_s7 + $0x78] sm:$0xff] }
   0xc   :  { %468 = vmatpush3.bf16.msra.mxu0 %v465_v45  ;;  %v489_v63 = vpack.c.bf16 %v269_v62, %v268_v60  ;;  %v140_v9 = vld [vmem:[%s705_s6] sm:$0x3] }
   0xd   :  { %464 = vmatpush1.bf16.msra.mxu1 %v463_v20  ;;  %470 = vmatprep.subr.bf16.mxu0 %v469_v48 }
  0x10   :  { %472 = vmatpush3.bf16.msra.mxu0 %v469_v48 }
  0x11   :  { %474 = vmatprep.subr.bf16.mxu0 %v473_v51 }
  0x14   :  { %476 = vmatpush3.bf16.msra.mxu0 %v473_v51 }
  0x15   :  { %478 = vmatprep.subr.bf16.mxu0 %v477_v54 }
  0x18   :  { %480 = vmatpush3.bf16.msra.mxu0 %v477_v54 }
  0x19   :  { %482 = vmatprep.subr.bf16.mxu0 %v481_v57 }
  0x1c   :  { %484 = vmatpush3.bf16.msra.mxu0 %v481_v57 }
  0x1d   :  { %486 = vmatprep.subr.bf16.mxu0 %v485_v61 }
  0x20   :  { %488 = vmatpush3.bf16.msra.mxu0 %v485_v61 }
  0x21   :  { %490 = vmatprep.subr.bf16.mxu0 %v489_v63 }
  0x24   :  { %492 = vmatpush3.bf16.msra.mxu0 %v489_v63 }
  0x75   :  { %v103_v29 = vpop.permute.xlu0 %102  ;;  %v105_v31 = vpop.permute.xlu1 %104 }
  0x76   :  { %v125_v33 = vsel %vm124_vm2, %v98_v30, %v103_v29  ;;  %v126_v37 = vsel %vm124_vm2, %v99_v34, %v105_v31 }
  0x79   :  { %v111_v32 = vpop.permute.xlu0 %110 }
  0x7a   :  { %v127_v35 = vsel %vm49_vm1, %v125_v33, %v111_v32 }
  0x7d   :  { %v113_v38 = vpop.permute.xlu0 %112 }
  0x7e   :  { %v128_v40 = vsel %vm49_vm1, %v126_v37, %v113_v38 }
  0xda   :  { %v87_v21 = vpop.f32.mrb[0].mxu1 }
  0xdb   :  { %v94_v22 = vmul.f32 2.0, %v87_v21  ;;  %v420_v23 = vpop.f32.mrb[1].mxu1 }
  0xdc   :  { %v90_v24 = vpop.f32.mrb[2].mxu1 }
  0xdd   :  { %v96_v25 = vsub.f32 %v94_v22, %v35_v4  ;;  %v95_v26 = vmul.f32 2.0, %v90_v24  ;;  %v421_v27 = vpop.f32.mrb[3].mxu1  ;;  %v14_v4 = vstv %s704_s8 }
  0xde   :  { %15 = vst [vmem:[#allocation2] sm:$0x1] %v14_v4 }
  0xdf   :  { %118 = vrot.lane.b32.xlu1 %v96_v25, %s525_s16  ;;  %v97_v28 = vsub.f32 %v95_v26, %v36_v7  ;;  %v143_v7 = vshrl.u32 %v142_v6, 7 }
  0xe1   :  { %v144_v8 = vsub.s32 0, %v143_v7  ;;  %v148_v19 = vsub.s32 1, %v143_v7 }
  0xe3   :  { %120 = vrot.lane.b32.xlu1 %v97_v28, %s525_s16  ;;  %v145_v10 = vrot.slane %v140_v9, %v144_v8  ;;  %v149_v20 = vrot.slane %v140_v9, %v148_v19 }
  0xe5   :  { %v395_v5 = vld [vmem:[#allocation2] ss:$0 sm:$0xff] }
  0xe6   :  { %356 = vperm.xlu0 %503, %v395_v5  }
 0x151   :  { %v119_v36 = vpop.permute.xlu1 %118 }
 0x152   :  { %v130_v39 = vsel %vm129_vm3, %v127_v35, %v119_v36 }
 0x153   :  { %391 = vmatmul.mubr.msk.f32.vlgmr.msra.gmra.mrb[4].mxu1 %vm152_vm4, %v130_v39 }
 0x154   :  { %229 = vmatprep.mubr.f32.mxu1 %v521_v0  ;;  %v270_v0 = vld [vmem:[%s703_s7 + $0x70] sm:$0xff] }
 0x155   :  { %v121_v41 = vpop.permute.xlu1 %120  ;;  %v493_v2 = vpack.c.bf16 %v271_v1, %v270_v0 }
 0x156   :  { %v131_v42 = vsel %vm129_vm3, %v128_v40, %v121_v41  ;;  %v348_v41 = vand.u32 127, %v142_v6 }
 0x157   :  { %392 = vmatmul.mubr.msk.f32.gmra.mrb[6].mxu1 %vm152_vm4, %v131_v42  ;;  %494 = vmatprep.subr.bf16.mxu0 %v493_v2 }
 0x158   :  { %496 = vmatpush3.bf16.msra.mxu0 %v493_v2  ;;  %vm377_vm5 = vcmp.eq.s32.totalorder %v348_v41, 0  ;;  %vm378_vm7 = vcmp.eq.s32.totalorder %v348_v41, 1 }
 0x165   :  { %v357_v44 = vpop.permute.xlu0 %356 }
 0x226   :  { %v225_v11 = vpop.f32.mrb[4].mxu1 }
 0x227   :  { %v226_v12 = vadd.f32 %v225_v11, %v145_v10  ;;  %v227_v13 = vpop.f32.mrb[5].mxu1 }
 0x228   :  { %v228_v23 = vadd.f32 %v227_v13, %v149_v20 }
 0x229   :  { %v393_v14 = vmul.f32 -1.442695, %v226_v12 }
 0x22a   :  { %v231_v15 = vpop.f32.mrb[6].mxu1 }
 0x22b   :  { %505 = vpow2.f32 %v393_v14  ;;  %v232_v16 = vadd.f32 %v231_v15, %v145_v10  ;;  %v233_v17 = vpop.f32.mrb[7].mxu1 }
 0x22c   :  { %v234_v26 = vadd.f32 %v233_v17, %v149_v20 }
 0x22d   :  { %v394_v18 = vmul.f32 -1.442695, %v232_v16 }
 0x22f   :  { %507 = vpow2.f32 %v394_v18 }
 0x235   :  { %v506_v21 = vpop.eup %505 }
 0x236   :  { %v242_v22 = vadd.f32 1.0, %v506_v21 }
 0x238   :  { %509 = vrcp.f32 %v242_v22 }
 0x239   :  { %v508_v24 = vpop.eup %507  ;;  %511 = vtanh.f32 %v228_v23 }
 0x23a   :  { %v243_v25 = vadd.f32 1.0, %v508_v24 }
 0x23c   :  { %513 = vrcp.f32 %v243_v25 }
 0x23d   :  { %515 = vtanh.f32 %v234_v26 }
 0x242   :  { %v510_v27 = vpop.eup %509 }
 0x243   :  { %v250_v28 = vsub.f32 1.0, %v510_v27  ;;  %v512_v29 = vpop.eup %511 }
 0x245   :  { %v252_v30 = vmul.f32 %v512_v29, %v250_v28 }
 0x246   :  { %v514_v31 = vpop.eup %513 }
 0x247   :  { %v254_v32 = vmax.f32 %v252_v30, 0.0  ;;  %v251_v33 = vsub.f32 1.0, %v514_v31  ;;  %v516_v34 = vpop.eup %515 }
 0x249   :  { %454 = vmatprep.mubr.f32.mxu0 %v254_v32  ;;  %v253_v35 = vmul.f32 %v516_v34, %v251_v33 }
 0x24b   :  { %v255_v36 = vmax.f32 %v253_v35, 0.0 }
 0x24d   :  { %455 = vmatmul.mubr.f32.vlgmr.msra.gmra.mrb[0].mxu0 %v255_v36 }
 0x320   :  { %v456_v37 = vpop.f32.mrb[0].mxu0 }
 0x321   :  { %v362_v38 = vmax.f32 %v456_v37, 0.0  ;;  %v338_v39 = vpop.f32.mrb[1].mxu0  ;;  %v360_v50 = vadd.f32 %v456_v37, %v357_v44 }
 0x322   :  { %v361_v40 = vmax.f32 %v338_v39, 0.0  ;;  %v359_v54 = vadd.f32 %v357_v44, %v338_v39 }
 0x323   :  { %517 = vrsqrt.f32 %v362_v38  ;;  %vm372_vm6 = vcmp.eq.f32.partialorder %v362_v38, inf  ;;  %v375_v46 = vand.u32 2147483648, %v362_v38  ;;  %vm374_vm8 = vcmp.eq.f32.partialorder %v362_v38, 0.0 }
 0x324   :  { %519 = vrsqrt.f32 %v361_v40  ;;  %vm365_vm9 = vcmp.eq.f32.partialorder %v361_v40, inf  ;;  %v368_v49 = vand.u32 2147483648, %v361_v40  ;;  %vm367_vm10 = vcmp.eq.f32.partialorder %v361_v40, 0.0 }
 0x32d   :  { %v518_v42 = vpop.eup %517 }
 0x32e   :  { %v520_v43 = vpop.eup %519  ;;  %v371_v45 = vmul.f32 %v518_v42, %v362_v38 }
 0x32f   :  { %v364_v47 = vmul.f32 %v520_v43, %v361_v40 }
 0x330   :  { %v373_v48 = vsel %vm372_vm6, %v362_v38, %v371_v45 }
 0x331   :  { %v376_v51 = vsel %vm374_vm8, %v375_v46, %v373_v48  ;;  %v366_v52 = vsel %vm365_vm9, %v361_v40, %v364_v47 }
 0x332   :  { %v380_v53 = vsel %vm378_vm7, %v376_v51, 0.0  ;;  %v369_v55 = vsel %vm367_vm10, %v368_v49, %v366_v52 }
 0x333   :  { %v382_v56 = vsel %vm377_vm5, %v360_v50, %v380_v53  ;;  %v379_v57 = vsel %vm378_vm7, %v369_v55, 0.0 }
 0x334   :  { %v381_v58 = vsel %vm377_vm5, %v359_v54, %v379_v57  ;;  %384 = vst [vmem:[%s706_s9 + $0x8] sm:$0xff] %v382_v56 }
 0x335   :  { %383 = vst [vmem:[%s706_s9] sm:$0xff] %v381_v58 }

</bundles_post_ra>
